<compile_context>
chip_gen: v5e
topology: v5e:2x2
jax: 0.10.0
libtpu: 0.0.40
codegen_flags: <defaults>
</compile_context>

<pallas_src>
import functools

import jax
import jax.numpy as jnp
from jax import lax
from jax.experimental import pallas as pl
from jax.experimental.pallas import tpu as pltpu

LANES = 128
SUBLANES = 8                           # f32 accumulator sublane tile
MAX_BLOCK_BYTES = 2 * 1024 * 1024      # ~2 MiB per input block
VMEM_LIMIT_BYTES = 32 * 1024 * 1024    # explicit: v5e default is only 16 MiB


def _round_up(x, m):
    return (x + m - 1) // m * m


def _min_sublanes(dtype):
    # minimum sublane tile by element width: f32->8, bf16->16, int8/fp8->32
    return {4: 8, 2: 16, 1: 32}.get(jnp.dtype(dtype).itemsize, 8)


def _mse_partial_kernel(x_ref, t_ref, out_ref, *, tile_rows, steps,
                        num_blocks, num_parts, rows_total):
    p = pl.program_id(0)          # partition ("parallel": 2-way TC split)
    i = pl.program_id(1)          # reduction step within the partition
    block_idx = p * steps + i

    @pl.when(i == 0)
    def _():
        out_ref[...] = jnp.zeros_like(out_ref)

    last_block = num_blocks - 1
    tail_rows = rows_total - last_block * tile_rows   # valid rows, last block
    has_row_tail = tail_rows != tile_rows             # Python-level flags
    needs_block_guard = num_parts * steps != num_blocks

    def _acc(mask_tail):
        # Cast in-kernel so bf16 feature maps stream at half the HBM bytes.
        d = x_ref[...].astype(jnp.float32) - t_ref[...].astype(jnp.float32)
        if mask_tail:
            # Only traced for the last (partial) block; column iota keeps it
            # to one (tile_rows, 1) intermediate.
            row_ids = lax.broadcasted_iota(jnp.int32, (tile_rows, 1), 0)
            d = jnp.where(row_ids < tail_rows, d, 0.0)
        dsq = d * d
        # Per-(sublane, lane) partial sums: pure VPU work, no per-step XLU.
        out_ref[...] += jnp.sum(
            dsq.reshape(tile_rows // SUBLANES, SUBLANES, LANES), axis=0
        ).reshape(1, SUBLANES, LANES)

    if not has_row_tail and not needs_block_guard:
        _acc(False)                       # common path
    elif has_row_tail:
        @pl.when(block_idx < last_block)
        def _():
            _acc(False)

        @pl.when(block_idx == last_block)
        def _():
            _acc(True)
        # block_idx > last_block (duplicated clamped block): contributes 0.
    else:
        # Only the duplicated clamped block on odd splits must be skipped.
        @pl.when(block_idx < num_blocks)
        def _():
            _acc(False)


def content_loss_forward(x, target):
    """Mirrors ContentLoss.forward: returns (input, loss), where
    loss = F.mse_loss(input, target) with 'mean' reduction."""
    assert x.shape == target.shape, "input/target must match (like mse_loss)"
    n_true = x.size

    xf = jnp.ravel(x)          # bitcast reshape: no copy
    tf = jnp.ravel(target)

    rows = n_true // LANES
    rem = n_true - rows * LANES

    total = jnp.zeros((), jnp.float32)

    if rows > 0:
        n_main = rows * LANES
        if rem:
            # TODO(synk): prefix slice may materialize for lane-misaligned
            # sizes; the common feature-map case (rem == 0) is copy-free.
            xm, tm_ = xf[:n_main], tf[:n_main]
        else:
            xm, tm_ = xf, tf
        x2 = xm.reshape(rows, LANES)
        t2 = tm_.reshape(rows, LANES)

        itemsize = max(jnp.dtype(x.dtype).itemsize,
                       jnp.dtype(target.dtype).itemsize)
        min_sub = max(_min_sublanes(x.dtype), _min_sublanes(target.dtype))
        cap_rows = max(min_sub,
                       (MAX_BLOCK_BYTES // (LANES * itemsize))
                       // min_sub * min_sub)
        tile_rows = min(cap_rows, _round_up(rows, min_sub))

        num_blocks = pl.cdiv(rows, tile_rows)
        # Always 2 partitions when >=2 blocks so a 2-TC chip (v7x) never
        # leaves a core idle; harmless (sequential) on 1-TC v5e/v6e.
        num_parts = 2 if num_blocks >= 2 else 1
        steps = pl.cdiv(num_blocks, num_parts)

        kernel = functools.partial(
            _mse_partial_kernel, tile_rows=tile_rows, steps=steps,
            num_blocks=num_blocks, num_parts=num_parts, rows_total=rows)

        def in_map(p, i):
            # Clamp: partition 1's overhanging step re-reads a valid block;
            # its contribution is zeroed in-kernel by the block guard.
            return (jnp.minimum(p * steps + i, num_blocks - 1), 0)

        partials = pl.pallas_call(
            kernel,
            out_shape=jax.ShapeDtypeStruct((num_parts, SUBLANES, LANES),
                                           jnp.float32),
            grid_spec=pltpu.PrefetchScalarGridSpec(
                num_scalar_prefetch=0,
                grid=(num_parts, steps),
                in_specs=[
                    pl.BlockSpec((tile_rows, LANES), in_map),
                    pl.BlockSpec((tile_rows, LANES), in_map),
                ],
                out_specs=pl.BlockSpec((1, SUBLANES, LANES),
                                       lambda p, i: (p, 0, 0)),
            ),
            compiler_params=pltpu.CompilerParams(
                # TODO(synk): on v7x verify "parallel" actually shards the
                # p-axis across both TensorCores (switch to CORE_PARALLEL if
                # the trace shows a single-core stream).
                dimension_semantics=("parallel", "arbitrary"),
                vmem_limit_bytes=VMEM_LIMIT_BYTES,
            ),
        )(x2, t2)

        total = total + jnp.sum(partials)

    if rem:
        # <128-element lane tail: tiny scalar contribution, no full-array pad.
        xt = xf[rows * LANES:].astype(jnp.float32)
        tt = tf[rows * LANES:].astype(jnp.float32)
        dt = xt - tt
        total = total + jnp.sum(dt * dt)

    loss = total / jnp.float32(n_true)

    # ContentLoss.forward returns the input untouched; loss is a side value.
    return x, loss


if __name__ == "__main__":
    key = jax.random.PRNGKey(0)
    k1, k2, k3, k4, k5, k6, k7, k8 = jax.random.split(key, 8)

    # 1) Small conv-feature-map shape (aligned, single block).
    x = jax.random.normal(k1, (2, 4, 16, 16), dtype=jnp.float32)
    target = jax.random.normal(k2, (2, 4, 16, 16), dtype=jnp.float32)
    out, loss = content_loss_forward(x, target)
    jax.block_until_ready((out, loss))
    ref = jnp.mean((x - target) ** 2)
    assert jnp.allclose(loss, ref, rtol=1e-5, atol=1e-6), (loss, ref)
    assert jnp.array_equal(out, x)

    # 2) Multi-block, odd block count (2-partition clamp + block guard) and
    #    partial last block (row-tail mask).
    xb = jax.random.normal(k3, (2, 8, 1084, 128), dtype=jnp.float32)
    tb = jax.random.normal(k4, (2, 8, 1084, 128), dtype=jnp.float32)
    outb, lossb = content_loss_forward(xb, tb)
    jax.block_until_ready((outb, lossb))
    refb = jnp.mean((xb - tb) ** 2)
    assert jnp.allclose(lossb, refb, rtol=1e-4, atol=1e-6), (lossb, refb)
    assert jnp.array_equal(outb, xb)

    # 3) bf16 inputs (16-sublane min tile, in-kernel f32 accumulation).
    xc = jax.random.normal(k5, (2, 4, 16, 16), dtype=jnp.bfloat16)
    tc = jax.random.normal(k6, (2, 4, 16, 16), dtype=jnp.bfloat16)
    outc, lossc = content_loss_forward(xc, tc)
    jax.block_until_ready((outc, lossc))
    refc = jnp.mean((xc.astype(jnp.float32) - tc.astype(jnp.float32)) ** 2)
    assert jnp.allclose(lossc, refc, rtol=1e-5, atol=1e-6), (lossc, refc)

    # 4) Lane-misaligned element count (scalar tail path, no full-array pad).
    xd = jax.random.normal(k7, (8, 131), dtype=jnp.float32)
    td = jax.random.normal(k8, (8, 131), dtype=jnp.float32)
    outd, lossd = content_loss_forward(xd, td)
    jax.block_until_ready((outd, lossd))
    refd = jnp.mean((xd - td) ** 2)
    assert jnp.allclose(lossd, refd, rtol=1e-5, atol=1e-6), (lossd, refd)

    print("KERNEL_OK")
</pallas_src>

<mosaic_0001>
module attributes {stable_mosaic.version = 11 : i64} {
  func.func @_mse_partial_kernel(%arg0: i32, %arg1: i32, %arg2: memref<16x128xf32, #tpu.memory_space<vmem>>, %arg3: memref<16x128xf32, #tpu.memory_space<vmem>>, %arg4: memref<1x8x128xf32, #tpu.memory_space<vmem>>) attributes {dimension_semantics = [#tpu.dimension_semantics<parallel>, #tpu.dimension_semantics<arbitrary>], iteration_bounds = array<i64: 1, 1>, scalar_prefetch = 0 : i64, scratch_operands = 0 : i64, tpu.core_type = #tpu.core_type<tc>, window_params = [{transform_indices = @transform_0, window_bounds = array<i64: 16, 128>}, {transform_indices = @transform_1, window_bounds = array<i64: 16, 128>}, {transform_indices = @transform_2, window_bounds = array<i64: 1, 8, 128>}]} {
    %c0_i32 = arith.constant 0 : i32
    %0 = arith.cmpi eq, %arg1, %c0_i32 : i32
    %1 = arith.extui %0 : i1 to i32
    %c0_i32_0 = arith.constant 0 : i32
    %2 = arith.cmpi ne, %1, %c0_i32_0 : i32
    scf.if %2 {
      %cst_10 = arith.constant 0.000000e+00 : f32
      %13 = vector.broadcast %cst_10 : f32 to vector<1x8x128xf32>
      %c0_11 = arith.constant 0 : index
      %c0_12 = arith.constant 0 : index
      %c0_13 = arith.constant 0 : index
      %14 = vector.load %arg4[%c0_11, %c0_12, %c0_13] : memref<1x8x128xf32, #tpu.memory_space<vmem>>, vector<1x8x128xf32>
      tpu.vector_store %arg4[%c0_11, %c0_12, %c0_13], %13 {strides = array<i32>} : memref<1x8x128xf32, #tpu.memory_space<vmem>>, vector<1x8x128xf32>,
    } else {
    }
    %c0 = arith.constant 0 : index
    %c0_1 = arith.constant 0 : index
    %3 = vector.load %arg2[%c0, %c0_1] : memref<16x128xf32, #tpu.memory_space<vmem>>, vector<16x128xf32>
    %c0_2 = arith.constant 0 : index
    %c0_3 = arith.constant 0 : index
    %4 = vector.load %arg3[%c0_2, %c0_3] : memref<16x128xf32, #tpu.memory_space<vmem>>, vector<16x128xf32>
    %5 = arith.subf %3, %4 : vector<16x128xf32>
    %6 = arith.mulf %5, %5 : vector<16x128xf32>
    %c0_4 = arith.constant 0 : index
    %c0_5 = arith.constant 0 : index
    %c0_6 = arith.constant 0 : index
    %7 = vector.load %arg4[%c0_4, %c0_5, %c0_6] : memref<1x8x128xf32, #tpu.memory_space<vmem>>, vector<1x8x128xf32>
    %8 = vector.shape_cast %6 : vector<16x128xf32> to vector<2x8x128xf32>
    %cst = arith.constant dense<0.000000e+00> : vector<8x128xf32>
    %9 = vector.multi_reduction <add>, %8, %cst [0] : vector<2x8x128xf32> to vector<8x128xf32>
    %10 = vector.shape_cast %9 : vector<8x128xf32> to vector<1x8x128xf32>
    %11 = arith.addf %7, %10 : vector<1x8x128xf32>
    %c0_7 = arith.constant 0 : index
    %c0_8 = arith.constant 0 : index
    %c0_9 = arith.constant 0 : index
    %12 = vector.load %arg4[%c0_7, %c0_8, %c0_9] : memref<1x8x128xf32, #tpu.memory_space<vmem>>, vector<1x8x128xf32>
    tpu.vector_store %arg4[%c0_7, %c0_8, %c0_9], %11 {strides = array<i32>} : memref<1x8x128xf32, #tpu.memory_space<vmem>>, vector<1x8x128xf32>,
    return
  }
  func.func @transform_0(%arg0: i32, %arg1: i32) -> (i32, i32) {
    %c1_i32 = arith.constant 1 : i32
    %0 = arith.muli %arg0, %c1_i32 : i32
    %1 = arith.addi %0, %arg1 : i32
    %c0_i32 = arith.constant 0 : i32
    %2 = arith.minsi %1, %c0_i32 : i32
    %c0_i32_0 = arith.constant 0 : i32
    %c0_i32_1 = arith.constant 0 : i32
    return %2, %c0_i32_0 : i32, i32
  }
  func.func @transform_1(%arg0: i32, %arg1: i32) -> (i32, i32) {
    %c1_i32 = arith.constant 1 : i32
    %0 = arith.muli %arg0, %c1_i32 : i32
    %1 = arith.addi %0, %arg1 : i32
    %c0_i32 = arith.constant 0 : i32
    %2 = arith.minsi %1, %c0_i32 : i32
    %c0_i32_0 = arith.constant 0 : i32
    %c0_i32_1 = arith.constant 0 : i32
    return %2, %c0_i32_0 : i32, i32
  }
  func.func @transform_2(%arg0: i32, %arg1: i32) -> (i32, i32, i32) {
    %c0_i32 = arith.constant 0 : i32
    %c0_i32_0 = arith.constant 0 : i32
    %c0_i32_1 = arith.constant 0 : i32
    return %arg0, %c0_i32, %c0_i32_0 : i32, i32, i32
  }
}

</mosaic_0001>

<bundles_post_ra>
// kernel: tpu_custom_call.1
= control target key start
LH: loop header
LB: loop body
LE: loop exit
PB: predicated region body
PF: predicated region fallthrough
CT: control target
= control target key end

     0   :  { %7 = vsyncpa [#allocation3], 0  ;;  %s216_s0 = inlined_call_operand.hbm [shape: f32[16,128], index: 0, kind: input, shape index: {}]   ;;  %s217_s1 = inlined_call_operand.hbm [shape: f32[16,128], index: 1, kind: input, shape index: {}]   ;;  %s218_s2 = inlined_call_operand.hbm [shape: f32[1,8,128], index: 2, kind: output, shape index: {}]  }
   0x1   :  { %8 = vsyncpa [#allocation6], 0 }
   0x2   :  { %9 = vsyncpa [#allocation4], 0  ;;  %s20_s11 = sshll.u32 %s216_s0, 4  ;;  %s187_s12 = smov [#allocation2]   ;;  %s21_s11 = int_to_ptr.hbm [resolvable:$true] %s20_s11 }
   0x3   :  { %s22_s13 = sshll.u32 %s187_s12, 4  ;;  %s39_s16 = sshll.u32 %s217_s1, 4  ;;  %s23_s13 = int_to_ptr.vmem [resolvable:$true] %s22_s13  ;;  %s40_s16 = int_to_ptr.hbm [resolvable:$true] %s39_s16 }
   0x4   :  { %s188_s17 = smov 128   ;;  %s189_s18 = smov 8  }
   0x5   :  { %28 = dma.hbm_to_vmem [thread:$0]  %s21_s11, 256, %s23_s13, [#allocation3], %s188_s17, %s188_s17, %s189_s18  }
   0x6   :  { %s190_s19 = smov [#allocation5]  }
   0x7   :  { %s41_s20 = sshll.u32 %s190_s19, 4  ;;  %s42_s20 = int_to_ptr.vmem [resolvable:$true] %s41_s20 }
   0x8   :  { %47 = dma.hbm_to_vmem [thread:$0]  %s40_s16, 256, %s42_s20, [#allocation6], %s188_s17, %s188_s17, %s189_s18  }
   0x9   :  { %181 = dma.done.wait [#allocation3], 256  }
   0xa   :  { %182 = vsyncadd [#allocation3], 4294967040 }
   0xb   :  { %183 = dma.done.wait [#allocation6], 256  }
   0xc   :  { %184 = vsyncadd [#allocation6], 4294967040  ;;  %v69_v0 = vld [vmem:[#allocation2] sm:$0xff]  ;;  %v70_v1 = vld [vmem:[#allocation2 + $0x8] sm:$0xff]  ;;  %s191_s0 = smov [#allocation7]   ;;  %s88_s23 = sshll.u32 %s218_s2, 4  ;;  %s89_s23 = int_to_ptr.hbm [resolvable:$true] %s88_s23 }
   0xd   :  { %v71_v2 = vld [vmem:[#allocation5] sm:$0xff]  ;;  %v72_v3 = vld [vmem:[#allocation5 + $0x8] sm:$0xff]  ;;  %s86_s1 = sshll.u32 %s191_s0, 4  ;;  %s87_s1 = int_to_ptr.vmem [resolvable:$true] %s86_s1 }
   0xe   :  { %v73_v4 = vsub.f32 %v69_v0, %v71_v2  ;;  %v74_v5 = vsub.f32 %v70_v1, %v72_v3 }
  0x10   :  { %v75_v6 = vmul.f32 %v73_v4, %v73_v4  ;;  %v76_v7 = vmul.f32 %v74_v5, %v74_v5 }
  0x12   :  { %v78_v8 = vadd.f32 %v76_v7, %v75_v6 }
  0x14   :  { %80 = vst [vmem:[#allocation7] sm:$0xff] %v78_v8 }
  0x15   :  { %91 = dma.vmem_to_hbm [thread:$0]  %s87_s1, 128, %s89_s23, [#allocation4]  }
  0x16   :  { %185 = dma.done.wait [#allocation4], 128  }
  0x17   :  { %186 = vsyncadd [#allocation4], 4294967168 }
  0x18   :  { %96 = vsyncpa [#allocation3], 1 }
  0x19   :  { %97 = vsyncpa [#allocation6], 1 }
  0x1a   :  { %98 = vsyncpa [#allocation4], 1 }

</bundles_post_ra>
